<compile_context>
chip_gen: v7x
topology: tpu7x:2x2x1
jax: 0.10.0
libtpu: 0.0.40
codegen_flags: <defaults>
</compile_context>

<pallas_src>
import functools

import jax
import jax.numpy as jnp
from jax.experimental import pallas as pl
from jax.experimental.pallas import tpu as pltpu


def _round_up(x: int, m: int) -> int:
    return ((x + m - 1) // m) * m


def _nb_predictor_kernel(
    gp_ref,    # [tile_b, 4]  packed per-gene scalars [ck, cb, lk, lb]
    emb_ref,   # [tile_b, K]
    w_ref,     # [K, tile_n]  tile of fused (counts || logits) weight
    b_ref,     # [1, tile_n]  tile of fused bias
    out_ref,   # [tile_b, tile_n] tile of fused (counts || logits) output
    *,
    n_counts_tiles: int,
):
    # grid = (n_fused_tiles, n_b_tiles); axis 0 walks the fused column tiles.
    j = pl.program_id(0)

    # One fused MXU matmul (shared LHS for both heads), f32 accumulation.
    y = (
        jnp.dot(emb_ref[...], w_ref[...], preferred_element_type=jnp.float32)
        + b_ref[...]
    )

    gp = gp_ref[...]  # [tile_b, 4] f32

    @pl.when(j < n_counts_tiles)
    def _():  # counts half: k * y + b, then numerically-stable softplus
        x = gp[:, 0:1] * y + gp[:, 1:2]
        out_ref[...] = jnp.maximum(x, 0.0) + jnp.log1p(jnp.exp(-jnp.abs(x)))

    @pl.when(j >= n_counts_tiles)
    def _():  # logits half: plain affine, no transcendentals
        out_ref[...] = gp[:, 2:3] * y + gp[:, 3:4]


def nb_predictor_forward(
    embedding,
    params,
    gene_ids,
    *,
    compute_dtype=jnp.float32,   # jnp.bfloat16 halves weight HBM traffic
    tile_b: int = 256,
    tile_n: int = 1024,
):
    """Pallas implementation of NBPredictor.forward.

    embedding: [B, bottleneck] float32
    gene_ids:  [B] int32
    Returns (total_count, logits), each [B, n_cells] float32.
    """
    B, K = embedding.shape
    n_cells = params["w_counts"].shape[1]

    # Glue: per-gene Embedding(n_genes, 1) gathers, packed into one [B, 4] array.
    gp = jnp.concatenate(
        [
            jnp.take(params["counts_k"], gene_ids, axis=0),
            jnp.take(params["counts_b"], gene_ids, axis=0),
            jnp.take(params["logits_k"], gene_ids, axis=0),
            jnp.take(params["logits_b"], gene_ids, axis=0),
        ],
        axis=1,
    ).astype(jnp.float32)

    # Tile sizing: lane-dense (128-multiple) n tiles, 8-multiple B tiles.
    tile_b = min(tile_b, _round_up(B, 8))
    tile_n = min(tile_n, _round_up(n_cells, 128))
    assert tile_b % 8 == 0 and tile_n % 128 == 0
    B_pad = _round_up(B, tile_b)
    N_pad = _round_up(n_cells, tile_n)        # counts/logits split is tile-aligned

    # Host-side padding (zeros) so every tile is full and lane-dense.
    emb_p = jnp.zeros((B_pad, K), jnp.float32).at[:B].set(
        embedding.astype(jnp.float32)
    )
    gp_p = jnp.zeros((B_pad, 4), jnp.float32).at[:B].set(gp)

    def _pad_cols(a):
        return jnp.zeros((a.shape[0], N_pad), jnp.float32).at[:, :n_cells].set(
            a.astype(jnp.float32)
        )

    w_fused = jnp.concatenate(
        [_pad_cols(params["w_counts"]), _pad_cols(params["w_logits"])], axis=1
    )
    b_fused = jnp.concatenate(
        [_pad_cols(params["b_counts"]), _pad_cols(params["b_logits"])], axis=1
    )

    # MXU inputs in compute_dtype; bias / per-gene scalars / epilogue stay f32.
    emb_p = emb_p.astype(compute_dtype)
    w_fused = w_fused.astype(compute_dtype)

    n_counts_tiles = N_pad // tile_n
    n_fused_tiles = 2 * n_counts_tiles
    n_b_tiles = B_pad // tile_b

    # VMEM budget (double-buffered streams + headroom); conservative enough for
    # v7x's 64 MiB/TC, explicit so the 32 MiB scoped default never caps us.
    itemsize = jnp.dtype(compute_dtype).itemsize
    tile_bytes = (
        K * tile_n * itemsize      # weight tile
        + tile_n * 4               # bias tile
        + tile_b * K * itemsize    # embedding tile
        + tile_b * 4 * 4           # packed gene-param tile
        + tile_b * tile_n * 4      # output tile
    )
    vmem_limit = int(min(max(4 * tile_bytes, 32 * 1024 * 1024), 48 * 1024 * 1024))

    kernel = functools.partial(_nb_predictor_kernel, n_counts_tiles=n_counts_tiles)

    out = pl.pallas_call(
        kernel,
        out_shape=jax.ShapeDtypeStruct((B_pad, 2 * N_pad), jnp.float32),
        grid_spec=pltpu.PrefetchScalarGridSpec(
            num_scalar_prefetch=0,
            grid=(n_fused_tiles, n_b_tiles),   # weight axis outer, B axis inner
            in_specs=[
                pl.BlockSpec((tile_b, 4), lambda j, i: (i, 0)),   # gene params
                pl.BlockSpec((tile_b, K), lambda j, i: (i, 0)),   # embedding
                pl.BlockSpec((K, tile_n), lambda j, i: (0, j)),   # fused weight
                pl.BlockSpec((1, tile_n), lambda j, i: (0, j)),   # fused bias
            ],
            out_specs=pl.BlockSpec((tile_b, tile_n), lambda j, i: (i, j)),
        ),
        compiler_params=pltpu.CompilerParams(
            dimension_semantics=("parallel", "parallel"),
            vmem_limit_bytes=vmem_limit,
        ),
    )(gp_p, emb_p, w_fused, b_fused)

    counts = out[:B, :n_cells]
    logits = out[:B, N_pad:N_pad + n_cells]
    return counts, logits


def init_params(key, bottleneck, n_cells, n_genes):
    """Deterministic synthetic parameters matching NBPredictor.__init__ shapes."""
    ks = jax.random.split(key, 8)
    lin_scale = 1.0 / jnp.sqrt(jnp.float32(bottleneck))
    return {
        # nn.Embedding(n_genes, 1) -> [n_genes, 1]
        "counts_k": jax.random.normal(ks[0], (n_genes, 1), jnp.float32),
        "counts_b": jax.random.normal(ks[1], (n_genes, 1), jnp.float32),
        "logits_k": jax.random.normal(ks[2], (n_genes, 1), jnp.float32),
        "logits_b": jax.random.normal(ks[3], (n_genes, 1), jnp.float32),
        # nn.Linear(bottleneck, n_cells): weight stored pre-transposed as
        # [bottleneck, n_cells]; bias as [1, n_cells].
        "w_counts": jax.random.uniform(
            ks[4], (bottleneck, n_cells), jnp.float32, -lin_scale, lin_scale
        ),
        "b_counts": jax.random.uniform(
            ks[5], (1, n_cells), jnp.float32, -lin_scale, lin_scale
        ),
        "w_logits": jax.random.uniform(
            ks[6], (bottleneck, n_cells), jnp.float32, -lin_scale, lin_scale
        ),
        "b_logits": jax.random.uniform(
            ks[7], (1, n_cells), jnp.float32, -lin_scale, lin_scale
        ),
    }


def _reference_forward(embedding, params, gene_ids):
    """Plain-JAX reference (mirrors the PyTorch semantics, f32)."""
    s2c = embedding @ params["w_counts"] + params["b_counts"]
    s2l = embedding @ params["w_logits"] + params["b_logits"]
    ck = jnp.take(params["counts_k"], gene_ids, axis=0)
    cb = jnp.take(params["counts_b"], gene_ids, axis=0)
    lk = jnp.take(params["logits_k"], gene_ids, axis=0)
    lb = jnp.take(params["logits_b"], gene_ids, axis=0)
    counts = jax.nn.softplus(ck * s2c + cb)
    logits = lk * s2l + lb
    return counts, logits


if __name__ == "__main__":
    B = 13            # batch of peaks/sequences (deliberately ragged)
    BOTTLENECK = 32   # embedding dim
    N_CELLS = 200     # n_cells output dim (deliberately not 128-aligned)
    N_GENES = 24      # size of gene_id vocabulary

    key = jax.random.PRNGKey(0)
    k_emb, k_ids, k_params = jax.random.split(key, 3)

    embedding = jax.random.normal(k_emb, (B, BOTTLENECK), jnp.float32)
    gene_ids = jax.random.randint(k_ids, (B,), 0, N_GENES, jnp.int32)
    params = init_params(k_params, BOTTLENECK, N_CELLS, N_GENES)

    ref_counts, ref_logits = _reference_forward(embedding, params, gene_ids)

    # --- f32 path: small tiles to exercise the (fused-n x B) grid + padding ---
    counts, logits = nb_predictor_forward(
        embedding, params, gene_ids, tile_b=8, tile_n=128
    )
    counts = jax.block_until_ready(counts)
    logits = jax.block_until_ready(logits)
    assert counts.shape == (B, N_CELLS) and logits.shape == (B, N_CELLS)
    assert jnp.allclose(counts, ref_counts, atol=1e-4, rtol=1e-4)
    assert jnp.allclose(logits, ref_logits, atol=1e-4, rtol=1e-4)

    # --- bf16 weight/embedding path (mem-bound optimization), default tiles ---
    # bf16 weight quantization -> compare against the f32 reference loosely.
    counts_bf, logits_bf = nb_predictor_forward(
        embedding, params, gene_ids, compute_dtype=jnp.bfloat16
    )
    counts_bf = jax.block_until_ready(counts_bf)
    logits_bf = jax.block_until_ready(logits_bf)
    assert jnp.allclose(counts_bf, ref_counts, atol=1e-1, rtol=1e-1)
    assert jnp.allclose(logits_bf, ref_logits, atol=1e-1, rtol=1e-1)

    print("KERNEL_OK")
</pallas_src>

<mosaic_0001>
module attributes {stable_mosaic.version = 11 : i64} {
  func.func @_nb_predictor_kernel(%arg0: i32, %arg1: i32, %arg2: memref<8x4xf32, #tpu.memory_space<vmem>>, %arg3: memref<8x32xf32, #tpu.memory_space<vmem>>, %arg4: memref<32x128xf32, #tpu.memory_space<vmem>>, %arg5: memref<1x128xf32, #tpu.memory_space<vmem>>, %arg6: memref<8x128xf32, #tpu.memory_space<vmem>>) attributes {dimension_semantics = [#tpu.dimension_semantics<parallel>, #tpu.dimension_semantics<parallel>], iteration_bounds = array<i64: 4, 2>, scalar_prefetch = 0 : i64, scratch_operands = 0 : i64, tpu.core_type = #tpu.core_type<tc>, window_params = [{transform_indices = @transform_0, window_bounds = array<i64: 8, 4>}, {transform_indices = @transform_1, window_bounds = array<i64: 8, 32>}, {transform_indices = @transform_2, window_bounds = array<i64: 32, 128>}, {transform_indices = @transform_3, window_bounds = array<i64: 1, 128>}, {transform_indices = @transform_4, window_bounds = array<i64: 8, 128>}]} {
    %c0 = arith.constant 0 : index
    %c0_0 = arith.constant 0 : index
    %0 = vector.load %arg3[%c0, %c0_0] : memref<8x32xf32, #tpu.memory_space<vmem>>, vector<8x32xf32>
    %c0_1 = arith.constant 0 : index
    %c0_2 = arith.constant 0 : index
    %1 = vector.load %arg4[%c0_1, %c0_2] : memref<32x128xf32, #tpu.memory_space<vmem>>, vector<32x128xf32>
    %cst = arith.constant dense<0.000000e+00> : vector<8x128xf32>
    %2 = tpu.matmul %0, %1, %cst {dimension_numbers = #tpu.dot_dimension_numbers<[1], [0], [0], [1], [0, 0, 1, 1], [], []>} : vector<8x32xf32>, vector<32x128xf32>, vector<8x128xf32> -> vector<8x128xf32>
    %c0_3 = arith.constant 0 : index
    %c0_4 = arith.constant 0 : index
    %3 = vector.load %arg5[%c0_3, %c0_4] : memref<1x128xf32, #tpu.memory_space<vmem>>, vector<1x128xf32>
    %4 = vector.broadcast %3 : vector<1x128xf32> to vector<8x128xf32>
    %5 = arith.addf %2, %4 : vector<8x128xf32>
    %c0_5 = arith.constant 0 : index
    %c0_6 = arith.constant 0 : index
    %6 = vector.load %arg2[%c0_5, %c0_6] : memref<8x4xf32, #tpu.memory_space<vmem>>, vector<8x4xf32>
    %c2_i32 = arith.constant 2 : i32
    %7 = arith.cmpi slt, %arg0, %c2_i32 : i32
    %8 = arith.extui %7 : i1 to i32
    %c0_i32 = arith.constant 0 : i32
    %9 = arith.cmpi ne, %8, %c0_i32 : i32
    scf.if %9 {
      %13 = vector.extract_strided_slice %6 {offsets = [0, 0], sizes = [8, 1], strides = [1, 1]} : vector<8x4xf32> to vector<8x1xf32>
      %14 = vector.broadcast %13 : vector<8x1xf32> to vector<8x128xf32>
      %15 = arith.mulf %14, %5 : vector<8x128xf32>
      %16 = vector.extract_strided_slice %6 {offsets = [0, 1], sizes = [8, 1], strides = [1, 1]} : vector<8x4xf32> to vector<8x1xf32>
      %17 = vector.broadcast %16 : vector<8x1xf32> to vector<8x128xf32>
      %18 = arith.addf %15, %17 : vector<8x128xf32>
      %cst_9 = arith.constant 0.000000e+00 : f32
      %19 = vector.broadcast %cst_9 : f32 to vector<8x128xf32>
      %20 = arith.maximumf %18, %19 : vector<8x128xf32>
      %21 = math.absf %18 : vector<8x128xf32>
      %cst_10 = arith.constant 0.000000e+00 : f32
      %22 = vector.broadcast %cst_10 : f32 to vector<8x128xf32>
      %23 = arith.subf %22, %21 : vector<8x128xf32>
      %24 = math.exp %23 : vector<8x128xf32>
      %25 = math.log1p %24 : vector<8x128xf32>
      %26 = arith.addf %20, %25 : vector<8x128xf32>
      %c0_11 = arith.constant 0 : index
      %c0_12 = arith.constant 0 : index
      %27 = vector.load %arg6[%c0_11, %c0_12] : memref<8x128xf32, #tpu.memory_space<vmem>>, vector<8x128xf32>
      tpu.vector_store %arg6[%c0_11, %c0_12], %26 {strides = array<i32>} : memref<8x128xf32, #tpu.memory_space<vmem>>, vector<8x128xf32>,
    } else {
    }
    %c2_i32_7 = arith.constant 2 : i32
    %10 = arith.cmpi sge, %arg0, %c2_i32_7 : i32
    %11 = arith.extui %10 : i1 to i32
    %c0_i32_8 = arith.constant 0 : i32
    %12 = arith.cmpi ne, %11, %c0_i32_8 : i32
    scf.if %12 {
      %13 = vector.extract_strided_slice %6 {offsets = [0, 2], sizes = [8, 1], strides = [1, 1]} : vector<8x4xf32> to vector<8x1xf32>
      %14 = vector.broadcast %13 : vector<8x1xf32> to vector<8x128xf32>
      %15 = arith.mulf %14, %5 : vector<8x128xf32>
      %16 = vector.extract_strided_slice %6 {offsets = [0, 3], sizes = [8, 1], strides = [1, 1]} : vector<8x4xf32> to vector<8x1xf32>
      %17 = vector.broadcast %16 : vector<8x1xf32> to vector<8x128xf32>
      %18 = arith.addf %15, %17 : vector<8x128xf32>
      %c0_9 = arith.constant 0 : index
      %c0_10 = arith.constant 0 : index
      %19 = vector.load %arg6[%c0_9, %c0_10] : memref<8x128xf32, #tpu.memory_space<vmem>>, vector<8x128xf32>
      tpu.vector_store %arg6[%c0_9, %c0_10], %18 {strides = array<i32>} : memref<8x128xf32, #tpu.memory_space<vmem>>, vector<8x128xf32>,
    } else {
    }
    return
  }
  func.func @transform_0(%arg0: i32, %arg1: i32) -> (i32, i32) {
    %c0_i32 = arith.constant 0 : i32
    %c0_i32_0 = arith.constant 0 : i32
    return %arg1, %c0_i32 : i32, i32
  }
  func.func @transform_1(%arg0: i32, %arg1: i32) -> (i32, i32) {
    %c0_i32 = arith.constant 0 : i32
    %c0_i32_0 = arith.constant 0 : i32
    return %arg1, %c0_i32 : i32, i32
  }
  func.func @transform_2(%arg0: i32, %arg1: i32) -> (i32, i32) {
    %c0_i32 = arith.constant 0 : i32
    %c0_i32_0 = arith.constant 0 : i32
    return %c0_i32, %arg0 : i32, i32
  }
  func.func @transform_3(%arg0: i32, %arg1: i32) -> (i32, i32) {
    %c0_i32 = arith.constant 0 : i32
    %c0_i32_0 = arith.constant 0 : i32
    return %c0_i32, %arg0 : i32, i32
  }
  func.func @transform_4(%arg0: i32, %arg1: i32) -> (i32, i32) {
    %c0_i32 = arith.constant 0 : i32
    return %arg1, %arg0 : i32, i32
  }
}

</mosaic_0001>

<bundles_post_ra>
// kernel: tpu_custom_call.1
= control target key start
LH: loop header
LB: loop body
LE: loop exit
PB: predicated region body
PF: predicated region fallthrough
CT: control target
= control target key end

     0   :  { %9 = vsyncpa [#allocation3], 0  ;;  %s1130_s0 = inlined_call_operand.vmem [shape: f32[16,4], index: 0, kind: input, shape index: {}]   ;;  %s1131_s1 = inlined_call_operand.vmem [shape: f32[16,32], index: 1, kind: input, shape index: {}]   ;;  %s1132_s2 = inlined_call_operand.hbm [shape: f32[32,512], index: 2, kind: input, shape index: {}]   ;;  %s1133_s3 = inlined_call_operand.vmem [shape: f32[1,512], index: 3, kind: input, shape index: {}]   ;;  %s1134_s4 = inlined_call_operand.hbm [shape: f32[16,512], index: 4, kind: output, shape index: {}]  }
   0x1   :  { %11 = vsyncpa [#allocation3 + $0x1], 0 }
   0x2   :  { %12 = vsyncpa [#allocation4], 0 }
   0x3   :  { %14 = vsyncpa [#allocation4 + $0x1], 0  ;;  %s896_s15 = smov 0   ;;  %s898_s16 = smov 0  }
   0x4   :  { %s900_s17 = smov 0   ;;  %s902_s18 = smov 0  }
   0x5   :  { %s904_s19 = smov 0   ;;  %s906_s20 = smov 0  }
   0x6   :  { %s908_s21 = smov 0   ;;  %s910_s22 = smov 0  }
   0x7   :  { %s912_s23 = smov 0   ;;  %s914_s24 = smov 0  }
   0x8   :  { %s916_s25 = smov 0  }
   0x9 LB: > { %s543_s26 = sadd.s32 4294967295, %s857_s25   ;;  %s544_s27 = sadd.s32 4294967294, %s857_s25   ;;  %s857_s25 = sphi %s916_s25, %s20_s25   ;;  %s853_s24 = sphi %s914_s24, %s1158_s24   ;;  %s849_s23 = sphi %s912_s23, %s1157_s23   ;;  %s845_s22 = sphi %s910_s22, %s1156_s22   ;;  %s841_s21 = sphi %s908_s21, %s1155_s21   ;;  %s837_s20 = sphi %s906_s20, %s1154_s20   ;;  %s833_s19 = sphi %s904_s19, %s1153_s19   ;;  %s829_s18 = sphi %s902_s18, %s1152_s18   ;;  %s825_s17 = sphi %s900_s17, %s1151_s17   ;;  %s821_s16 = sphi %s898_s16, %s1150_s16   ;;  %s817_s15 = sphi %s896_s15, %s1149_s15  }
   0xa   : > { %s29_s28 = sadd.s32 1, %s849_s23  ;;  %s32_s29 = sadd.s32 1, %s853_s24 }
   0xb   : > { %p30_p0 = scmp.ge.s32.totalorder %s29_s28, 2  ;;  %s91_s30 = sadd.s32 1, %s837_s20 }
   0xc   : > { %p98_p1 = scmp.ne.s32.totalorder %s837_s20, %s833_s19  ;;  %p99_p2 = scmp.eq.s32.totalorder %s857_s25, 0 }
   0xd   : > { %s1160_s28 = smov (%p30_p0, %s29_s28), 0  ;;  %s1162_s29 = smov (!%p30_p0, %s32_s29), %s853_s24 }
   0xe   : > { %1138 = sst [smem:[#allocation8_spill]] %s1160_s28  ;;  %p960_p3 = por %p99_p2, %p98_p1 }
   0xf   : > { %p104_p4 = scmp.ne.s32.totalorder %s833_s19, %s829_s18  ;;  %p34_p5 = scmp.ge.s32.totalorder %s1162_s29, 4 }
  0x10   : > { %p105_p6 = scmp.eq.s32.totalorder %s543_s26, 0  ;;  %s140_s6 = ssub.s32 %s849_s23, %s1160_s28 }
  0x11   : > { %s145_s7 = sadd.s32 1, %s825_s17  ;;  %s1164_s29 = smov (%p34_p5, %s1162_s29), 0 }
  0x12   : > { %1140 = sst [smem:[#allocation9_spill]] %s1164_s29  ;;  %p970_p7 = por %p105_p6, %p104_p4 }
  0x13   : > { %p155_p8 = scmp.ne.s32.totalorder %s825_s17, %s821_s16  ;;  %s88_s9 = ssub.s32 %s853_s24, %s1164_s29 }
  0x14   : > { %p156_p9 = scmp.eq.s32.totalorder %s543_s26, 7  ;;  %p89_p10 = scmp.eq.s32.totalorder %s88_s9, 0 }
  0x15   : > { %s142_s10 = sor.u32 %s140_s6, %s88_s9  ;;  %p161_p13 = scmp.ne.s32.totalorder %s821_s16, %s817_s15 }
  0x16   : > { %p143_p11 = scmp.eq.s32.totalorder %s142_s10, 0  ;;  %p978_p12 = por %p156_p9, %p155_p8 }
  0x17   : > { %s983_s12 = scalar_select %p89_p10, %s837_s20, %s91_s30  }
  0x18   : > { %s1142_s11 = scalar_select %p978_p12, 1, 0 }
  0x19   : > { %s986_s13 = scalar_select %p143_p11, %s825_s17, %s145_s7  }
  0x1a   : > { %p162_p0 = scmp.eq.s32.totalorder %s544_s27, 7  ;;  %p597_p1 = scmp.lt.s32.totalorder %s857_s25, 8 }
  0x1b   : > { %s196_s18 = sand.u32 1, %s837_s20   ;;  %s548_s6 = sshll.u32 %s853_s24, 7 }
  0x1c   : > { %p991_p2 = por %p162_p0, %p161_p13  ;;  %s547_s26 = sshll.u32 %s196_s18, 5 }
  0x1d   : > { %s1000_s29 = scalar_lea.hbm %s1132_s2, %s548_s6  ;;  %s200_s30 = scalar_lea.vmem [#allocation2], %s547_s26 }
  0x1e   : > { %s1143_s14 = scalar_select %p991_p2, 1, 0 }
  0x1f   : > { %s206_s7 = sshll.u32 %s200_s30, 4  ;;  %p1006_p4 = pnand %p597_p1, %p960_p3  ;;  %s1002_s7 = int_to_ptr.vmem [resolvable:$true] %s206_s7 }
  0x20   : > { %s1010_s28 = scalar_lea.sflag [#allocation3], %s196_s18  ;;  %s705_s9 = scalar_lea.hbm %s1000_s29, 512 }
  0x21   : > { %p706_p5 = scmp.ne.s32.totalorder %s1000_s29, %s705_s9  ;;  %p707_p6 = pneg %p1006_p4 }
  0x22   : > { %s710_s5 = scalar_lea.hbm %s1132_s2, 2048  ;;  %p711_p3 = scmp.lt.u32.totalorder %s1000_s29, %s1132_s2 }
  0x23   : > { %p708_p8 = pnand %p707_p6, %p706_p5  ;;  %p712_p10 = scmp.lt.u32.totalorder %s710_s5, %s705_s9 }
  0x24   : > { %p714_p13 = scmp.lt.u32.totalorder %s705_s9, %s1000_s29 }
  0x25   : > { %p709_p9 = pneg %p708_p8  ;;  %p713_p11 = por %p712_p10, %p711_p3 }
  0x27   : > { %p715_p0 = por %p714_p13, %p713_p11 }
  0x29   : > { %p716_p1 = pnand %p715_p0, %p709_p9 }
  0x2b   : > { %719 = shalt.err (!%p716_p1)
}
  0x2c   : > { %s720_s18 = scalar_lea.vmem %s1002_s7, 512  ;;  %s859_s26 = smov [#allocation2]  }
  0x2d   : > { %p721_p5 = scmp.ne.s32.totalorder %s1002_s7, %s720_s18  ;;  %s725_s6 = sshll.u32 %s859_s26, 4  ;;  %s726_s6 = int_to_ptr.vmem [resolvable:$false] %s725_s6 }
  0x2e   : > { %s727_s10 = scalar_lea.vmem %s726_s6, 1024  ;;  %p728_p12 = scmp.lt.s32.totalorder %s1002_s7, %s726_s6 }
  0x2f   : > { %p723_p8 = pnand %p721_p5, %p707_p6  ;;  %p729_p3 = scmp.lt.s32.totalorder %s727_s10, %s720_s18 }
  0x31   : > { %p724_p2 = pneg %p723_p8  ;;  %p730_p10 = por %p729_p3, %p728_p12 }
  0x33   : > { %p731_p11 = pnand %p730_p10, %p724_p2 }
  0x35   : > { %734 = shalt.err (!%p731_p11)
}
  0x36   : > { %s860_s9 = smov 512   ;;  %s861_s5 = smov 128  }
  0x37   : > { %s862_s30 = smov 8   ;;  %p549_p6 = scmp.ge.s32.totalorder %s857_s25, 1 }
  0x38   : > { %592 = dma.hbm_to_vmem [thread:$0]  (!%p1006_p4), %s1000_s29, 512, %s1002_s7, %s1010_s28, %s860_s9, %s861_s5, %s862_s30  }
  0x39   : > { %p220_p9 = scmp.lt.s32.totalorder %s857_s25, 9 }
  0x3b   : > { %p221_p13 = pnand %p549_p6, %p220_p9 }
  0x3c   : > { %s226_s18 = sand.u32 (!%p221_p13), 1, %s833_s19  }
  0x3d   : > { %224 = sbr.rel (%p221_p13) target bundleno = 499 (0x1f3), region = 36  ;;  %s550_s26 = sshll.u32 (!%p221_p13), %s226_s18, 5 }
  0x3e   : > { %s227_s6 = scalar_lea.sflag (!%p221_p13), [#allocation3], %s226_s18  ;;  %s230_s10 = scalar_lea.vmem (!%p221_p13), [#allocation2], %s550_s26 }
  0x44   : > { %808 = dma.done.wait (%p970_p7), %s227_s6, 512  }
  0x45   : > { %810 = vsyncadd (%p970_p7), %s227_s6, 4294966784  ;;  %s263_s28 = sand.u32 1, %s821_s16   ;;  %p266_p12 = scmp.lt.s32.totalorder %s841_s21, 1  ;;  %v863_v0 = vmov 0.0|0.0   ;;  %vm864_vm0 = vmmov 0   ;;  %v865_v1 = vmov 0.0  }
  0x46   : > { %s551_s29 = sshll.u32 %s263_s28, 3  ;;  %579 = vmatprep.subr.bf16.mxu0 %v863_v0  ;;  %576 = vmatprep.mubr.msk.f32.mxu0 %vm864_vm0, %v865_v1  ;;  %v278_v2 = vld [vmem:[%s230_s10] sm:$0xff]  ;;  %v279_v3 = vld [vmem:[%s230_s10 + $0x8] sm:$0xff]  ;;  %v280_v4 = vld [vmem:[%s230_s10 + $0x10] sm:$0xff]  ;;  %vm289_vm1 = vcmask 261120   ;;  %p274_p7 = scmp.lt.s32.totalorder %s845_s22, 3 }
  0x47   : > { %s267_s7 = scalar_select %p266_p12, %s841_s21, 1  ;;  %v580_v5 = vpack.c.bf16 %v279_v3, %v278_v2  ;;  %v281_v6 = vld [vmem:[%s230_s10 + $0x18] sm:$0xff] }
  0x48   : > { %v583_v8 = vpack.c.bf16 %v281_v6, %v280_v4  ;;  %s275_s6 = scalar_select %p274_p7, %s845_s22, 3 }
  0x49   : > { %s552_s27 = sshll.u32 %s267_s7, 3  ;;  %581 = vmatpush3.bf16.msra.mxu0 %v580_v5  ;;  %s1061_s10 = scalar_lea.vmem [#allocation5], %s551_s29 }
  0x4a   : > { %s269_s8 = scalar_lea.vmem %s1130_s0, %s552_s27  ;;  %582 = vmatprep.subr.bf16.mxu0 %v863_v0  ;;  %s273_s26 = scalar_lea.vmem %s1131_s1, %s552_s27 }
  0x4b   : > { %v363_v7 = vld [vmem:[%s269_s8] sm:$0xff]  ;;  %s276_s5 = scalar_lea.vmem %s1133_s3, %s275_s6  ;;  %p556_p2 = scmp.ge.s32.totalorder %s845_s22, 2 }
  0x4c   : > { %v277_v9 = vld [vmem:[%s273_s26] sm:$0xff]  ;;  %v866_v14 = vmov (!%p556_p2), 0   ;;  %v867_v15 = vmov (!%p556_p2), 1  }
  0x4d   : > { %584 = vmatpush3.bf16.msra.mxu0 %v583_v8  ;;  %v554_v10 = vld [vmem:[%s276_s5] ss:$0 sm:$0xff]  ;;  %697 = vset.pattern.permute.xlu0 (!%p556_p2), %v866_v14 }
  0x4e   : > { %370 = vperm.xlu0 (!%p556_p2), %697, %v363_v7  }
  0x50   : > { %577 = vmatmul.mubr.msk.f32.vlgmr.msra.gmra.mrb[0].mxu0 %vm289_vm1, %v277_v9 }
  0x52   : > { %698 = vset.pattern.permute.xlu0 (!%p556_p2), %v867_v15 }
  0x53   : > { %375 = vperm.xlu0 (!%p556_p2), %698, %v363_v7  }
  0xcd   : > { %v371_v16 = vpop.permute.xlu0 (!%p556_p2), %370 }
  0xd2   : > { %v376_v18 = vpop.permute.xlu0 (!%p556_p2), %375 }
 0x11e   : > { %367 = sbr.rel (%p556_p2) target bundleno = 334 (0x14e), region = 44 }
 0x123   : > { %v359_v11 = vpop.f32.mrb[0].mxu0 }
 0x124   : > { %v360_v12 = vadd.f32 %v554_v10, %v359_v11  ;;  %v578_v13 = vpop.f32.mrb[1].mxu0 }
 0x126   : > { %v373_v17 = vmul.f32 %v371_v16, %v360_v12 }
 0x128   : > { %v378_v19 = vadd.f32 %v376_v18, %v373_v17 }
 0x12a   : > { %v380_v20 = vand.u32 2147483647, %v378_v19  ;;  %v379_v31 = vmax.f32 %v378_v19, 0.0 }
 0x12c   : > { %v381_v21 = vsub.f32 0.0, %v380_v20 }
 0x12e   : > { %v382_v22 = vmul.f32 1.442695, %v381_v21 }
 0x130   : > { %699 = vpow2.f32 %v382_v22 }
 0x13a   : > { %v700_v23 = vpop.eup %699 }
 0x13b   : > { %v384_v24 = vadd.f32 1.0, %v700_v23  ;;  %v387_v25 = vmul.f32 -0.5, %v700_v23  ;;  %v390_v27 = vand.u32 2147483647, %v700_v23 }
 0x13d   : > { %701 = vlog2.f32 %v384_v24  ;;  %v388_v26 = vadd.f32 1.0, %v387_v25  ;;  %vm391_vm2 = vcmp.lt.f32.partialorder %v390_v27, 0.0004427343 }
 0x13f   : > { %v389_v30 = vmul.f32 %v700_v23, %v388_v26 }
 0x147   : > { %v702_v28 = vpop.eup %701 }
 0x148   : > { %v386_v29 = vmul.f32 0.6931472, %v702_v28 }
 0x14a   : > { %v392_v32 = vsel %vm391_vm2, %v389_v30, %v386_v29 }
 0x14b   : > { %v393_v33 = vadd.f32 %v392_v32, %v379_v31 }
 0x14d   : > { %394 = vst [vmem:[%s1061_s10] sm:$0xff] %v393_v33 }
 0x14e PF: > { %p557_p4 = scmp.lt.s32.totalorder %s845_s22, 2 }
 0x14f   : > { %v868_v34 = vmov (!%p557_p4), 2   ;;  %v869_v35 = vmov (!%p557_p4), 3  }
 0x150   : > { %398 = sbr.rel (%p557_p4) target bundleno = 473 (0x1d9), region = 48  ;;  %703 = vset.pattern.permute.xlu0 (!%p557_p4), %v868_v34 }
 0x151   : > { %401 = vperm.xlu0 (!%p557_p4), %703, %v363_v7  }
 0x155   : > { %704 = vset.pattern.permute.xlu0 (!%p557_p4), %v869_v35 }
 0x156   : > { %406 = vperm.xlu0 (!%p557_p4), %704, %v363_v7  }
 0x1d0   : > { %v402_v36 = vpop.permute.xlu0 %401 }
 0x1d1   : > { %v404_v37 = vmul.f32 %v402_v36, %v360_v12 }
 0x1d5   : > { %v407_v38 = vpop.permute.xlu0 %406 }
 0x1d6   : > { %v409_v39 = vadd.f32 %v407_v38, %v404_v37 }
 0x1d8   : > { %410 = vst [vmem:[%s1061_s10] sm:$0xff] %v409_v39 }
 0x1d9 PF: > { %s559_s29 = sshll.u32 %s841_s21, 2  ;;  %s427_s8 = sshll.u32 %s1061_s10, 4  ;;  %s1070_s8 = int_to_ptr.vmem [resolvable:$true] %s427_s8 }
 0x1da   : > { %s423_s27 = sadd.s32 %s845_s22, %s559_s29  ;;  %s412_s7 = scalar_lea.sflag [#allocation4], %s263_s28 }
 0x1db   : > { %s560_s30 = sshll.u32 %s423_s27, 7  ;;  %s735_s9 = scalar_lea.vmem %s1070_s8, 128 }
 0x1dc   : > { %s425_s6 = scalar_lea.hbm %s1134_s4, %s560_s30  ;;  %p736_p0 = scmp.ne.s32.totalorder %s1070_s8, %s735_s9 }
 0x1dd   : > { %p1145_p1 = scmp.ne.s32.totalorder %s1142_s11, 0  ;;  %s870_s21 = smov [#allocation5]  }
 0x1de   : > { %s739_s22 = sshll.u32 %s870_s21, 4  ;;  %s740_s22 = int_to_ptr.vmem [resolvable:$false] %s739_s22 }
 0x1df   : > { %p737_p5 = pnand %p736_p0, %p1145_p1  ;;  %s741_s5 = scalar_lea.vmem %s740_s22, 256 }
 0x1e0   : > { %p742_p3 = scmp.lt.s32.totalorder %s1070_s8, %s740_s22  ;;  %p743_p10 = scmp.lt.s32.totalorder %s741_s5, %s735_s9 }
 0x1e1   : > { %p738_p8 = pneg %p737_p5 }
 0x1e2   : > { %p744_p11 = por %p743_p10, %p742_p3 }
 0x1e4   : > { %p745_p6 = pnand %p744_p11, %p738_p8 }
 0x1e6   : > { %748 = shalt.err (!%p745_p6)
}
 0x1e7   : > { %s749_s10 = scalar_lea.hbm %s425_s6, 128  ;;  %s753_s27 = scalar_lea.hbm %s1134_s4, 1024 }
 0x1e8   : > { %p750_p9 = scmp.ne.s32.totalorder %s425_s6, %s749_s10  ;;  %p754_p7 = scmp.lt.u32.totalorder %s425_s6, %s1134_s4 }
 0x1e9   : > { %p755_p2 = scmp.lt.u32.totalorder %s753_s27, %s749_s10  ;;  %p757_p0 = scmp.lt.u32.totalorder %s749_s10, %s425_s6 }
 0x1ea   : > { %p751_p13 = pnand %p750_p9, %p1145_p1 }
 0x1eb   : > { %p756_p4 = por %p755_p2, %p754_p7 }
 0x1ec   : > { %p752_p12 = pneg %p751_p13 }
 0x1ed   : > { %p758_p5 = por %p757_p0, %p756_p4 }
 0x1ef   : > { %p759_p8 = pnand %p758_p5, %p752_p12 }
 0x1f1   : > { %762 = shalt.err (!%p759_p8)
}
 0x1f2   : > { %587 = dma.vmem_to_hbm [thread:$0]  (%p1145_p1), %s1070_s8, 128, %s425_s6, %s412_s7  }
 0x1f3 PF: > { %p598_p3 = scmp.ge.s32.totalorder %s857_s25, 2  ;;  %s439_s26 = sand.u32 1, %s817_s15  }
 0x1f4   : > { %p1146_p10 = scmp.ne.s32.totalorder %s1143_s14, 0  ;;  %s440_s9 = scalar_lea.sflag [#allocation4], %s439_s26 }
 0x1f6   : > { %p594_p11 = pnand %p598_p3, %p1146_p10 }
 0x1f8   : > { %812 = dma.done.wait (!%p594_p11), %s440_s9, 128  }
 0x1f9   : > { %814 = vsyncadd (!%p594_p11), %s440_s9, 4294967168  ;;  %s20_s25 = sadd.s32 1, %s857_s25   ;;  %s1147_s11 = sld [smem:[#allocation8_spill]] }
 0x1fa   : > { %p17_p6 = scmp.ge.s32.totalorder %s20_s25, 10   ;;  %s1148_s8 = sld [smem:[#allocation9_spill]] }
 0x1fb   : > { %s1149_s15 = smov %s821_s16  ;;  %s1150_s16 = smov %s825_s17 }
 0x1fc   : > { %s1151_s17 = smov %s986_s13  ;;  %s1152_s18 = smov %s833_s19 }
 0x1fd   : > { %s1153_s19 = smov %s837_s20  ;;  %s1154_s20 = smov %s983_s12 }
 0x1fe   : > { %s1155_s21 = smov %s849_s23  ;;  %s1156_s22 = smov %s853_s24 }
 0x1ff   : > { %s1157_s23 = smov %s1147_s11  ;;  %19 = sbr.rel (!%p17_p6) target bundleno = 9 (0x9), region = 98 }
 0x200   : > { %s1158_s24 = smov %s1148_s8 }
 0x206   :  { %445 = vsyncpa [#allocation3], 1 }
 0x207   :  { %447 = vsyncpa [#allocation3 + $0x1], 1 }
 0x208   :  { %448 = vsyncpa [#allocation4], 1 }
 0x209   :  { %450 = vsyncpa [#allocation4 + $0x1], 1 }

</bundles_post_ra>
